<compile_context>
chip_gen: v7x
topology: tpu7x:2x2x1
jax: 0.10.0
libtpu: 0.0.40
codegen_flags: <defaults>
</compile_context>

<pallas_src>
import jax
import jax.numpy as jnp
from jax import lax
from jax.experimental import pallas as pl
from jax.experimental.pallas import tpu as pltpu


def _pos_enc_kernel(colT_ref, rowT_ref, out_ref):
    """Build one channel half of the (2C, H*W) slab, directly channel-major.

    colT_ref: (c_tile, W)  column embeddings, channel-major (x / first C chans)
    rowT_ref: (c_tile, H)  row embeddings, channel-major    (y / last  C chans)
    out_ref : (c_tile, H*W); grid axis 0 == 0 writes the col half, == 1 the
              row half; grid axis 1 walks channel tiles.
    """
    W = colT_ref.shape[1]
    H = rowT_ref.shape[1]
    HW = out_ref.shape[1]
    half = pl.program_id(0)

    # Shared iotas: candidate row index i over sublanes, flat BEV index l over
    # lanes.  All selection math below is comparisons / mul / sub only.
    i_idx = lax.broadcasted_iota(jnp.int32, (H, HW), 0)            # (H, HW)
    l_idx = lax.broadcasted_iota(jnp.int32, (H, HW), 1)            # (H, HW)

    @pl.when(half == 0)
    def _():
        # col half: out[c, i*W + j] = colT[c, j]
        # S[j, l] = 1 iff (l mod W) == j, built mod-free:
        #   l_div = #{i : l >= (i+1)*W} == l // W   (sum of 0/1 comparisons)
        #   l_mod = l - W * l_div                   (exact small ints in f32)
        ge = (l_idx >= (i_idx + 1) * W).astype(jnp.float32)        # (H, HW)
        l_div = jnp.sum(ge, axis=0, keepdims=True)                 # (1, HW)
        l_f = lax.broadcasted_iota(jnp.int32, (1, HW), 1).astype(jnp.float32)
        l_mod = l_f - l_div * W                                    # (1, HW)
        j_f = lax.broadcasted_iota(jnp.int32, (W, HW), 0).astype(jnp.float32)
        sel = (jnp.broadcast_to(l_mod, (W, HW)) == j_f).astype(jnp.float32)
        out_ref[...] = jnp.dot(
            colT_ref[...].astype(jnp.float32), sel,
            preferred_element_type=jnp.float32,
        ).astype(out_ref.dtype)

    @pl.when(half == 1)
    def _():
        # row half: out[c, i*W + j] = rowT[c, i]
        # R[i, l] = 1 iff i*W <= l < (i+1)*W   (comparisons only)
        low = i_idx * W
        sel = ((l_idx >= low) & (l_idx < low + W)).astype(jnp.float32)
        out_ref[...] = jnp.dot(
            rowT_ref[...].astype(jnp.float32), sel,
            preferred_element_type=jnp.float32,
        ).astype(out_ref.dtype)


def learned_positional_encoding(mask, row_embed, col_embed, *, c_tile=None,
                                out_dtype=None):
    """mask: (B, H, W); row_embed: (row_num_embed, C); col_embed: (col_num_embed, C).

    Returns pos of shape (B, 2*C, H, W) (NCHW), dtype = out_dtype or embedding dtype.
    """
    B, H, W = mask.shape
    C = row_embed.shape[-1]
    if out_dtype is None:
        out_dtype = row_embed.dtype
    if c_tile is None:
        c_tile = C          # full-C out block: right choice for BEVFormer-tiny
    assert C % c_tile == 0 and (c_tile == C or c_tile % 8 == 0), (C, c_tile)
    n_ct = C // c_tile

    # torch.arange embedding lookup == slicing the leading table rows; the
    # transpose of these tiny (<=50 x 128) tables is free in XLA and lets the
    # kernel emit the slab directly channel-major.
    colT = col_embed[:W].T          # (C, W)
    rowT = row_embed[:H].T          # (C, H)

    pos_flat = pl.pallas_call(
        _pos_enc_kernel,
        out_shape=jax.ShapeDtypeStruct((2 * C, H * W), out_dtype),
        grid=(2, n_ct),
        in_specs=[
            pl.BlockSpec((c_tile, W), lambda h, c: (c, 0)),   # colT (full W)
            pl.BlockSpec((c_tile, H), lambda h, c: (c, 0)),   # rowT (full H)
        ],
        out_specs=pl.BlockSpec((c_tile, H * W), lambda h, c: (h * n_ct + c, 0)),
        compiler_params=pltpu.CompilerParams(
            dimension_semantics=("parallel", "parallel"),
        ),
    )(colT, rowT)

    # Free row-major reshape to the NCHW slab, then batch-broadcast.
    # NOTE(perf): verify in a profile that this broadcast fuses into the
    # consumer; if the consumer forces materialization (e.g. another
    # pallas_call), consume the (2C, H, W) slab directly instead of paying a
    # B-fold HBM write.
    pos = pos_flat.reshape(2 * C, H, W)
    return jnp.broadcast_to(pos[None], (B, 2 * C, H, W))


def _reference(mask, row_embed, col_embed):
    B, H, W = mask.shape
    x_embed = col_embed[:W]                               # (W, C)
    y_embed = row_embed[:H]                               # (H, C)
    C = x_embed.shape[-1]
    x_part = jnp.broadcast_to(x_embed[None, :, :], (H, W, C))
    y_part = jnp.broadcast_to(y_embed[:, None, :], (H, W, C))
    pos = jnp.concatenate([x_part, y_part], axis=-1)      # (H, W, 2C)
    pos = jnp.transpose(pos, (2, 0, 1))                   # (2C, H, W)
    return jnp.broadcast_to(pos[None], (B, 2 * C, H, W))


if __name__ == "__main__":
    # Small stand-in shapes (real module: C=128, H=W=50, tables 50x128).
    # H != W on purpose to exercise the row/col layout; table sizes exceed
    # H / W to exercise the leading-row slice (torch.arange lookup).
    num_feats = 32          # C
    row_num_embed = 20      # >= H
    col_num_embed = 28      # >= W
    B, H, W = 2, 16, 24

    key = jax.random.PRNGKey(0)
    k_row, k_col, k_mask = jax.random.split(key, 3)

    # Deterministic "learned" embedding tables (nn.Embedding weights).
    row_embed = jax.random.normal(k_row, (row_num_embed, num_feats), jnp.float32)
    col_embed = jax.random.normal(k_col, (col_num_embed, num_feats), jnp.float32)

    # Mask only contributes its shape / batch size (as in the PyTorch module).
    mask = (jax.random.uniform(k_mask, (B, H, W)) > 0.5).astype(jnp.float32)

    pos = learned_positional_encoding(mask, row_embed, col_embed)
    pos = jax.block_until_ready(pos)

    ref = _reference(mask, row_embed, col_embed)
    assert pos.shape == (B, 2 * num_feats, H, W), pos.shape
    assert jnp.allclose(pos, ref), "mismatch vs reference"

    print("KERNEL_OK")
</pallas_src>

<mosaic_0001>
module attributes {stable_mosaic.version = 11 : i64} {
  func.func @_pos_enc_kernel(%arg0: i32, %arg1: i32, %arg2: memref<32x24xf32, #tpu.memory_space<vmem>>, %arg3: memref<32x16xf32, #tpu.memory_space<vmem>>, %arg4: memref<32x384xf32, #tpu.memory_space<vmem>>) attributes {dimension_semantics = [#tpu.dimension_semantics<parallel>, #tpu.dimension_semantics<parallel>], iteration_bounds = array<i64: 2, 1>, scalar_prefetch = 0 : i64, scratch_operands = 0 : i64, tpu.core_type = #tpu.core_type<tc>, window_params = [{transform_indices = @transform_0, window_bounds = array<i64: 32, 24>}, {transform_indices = @transform_1, window_bounds = array<i64: 32, 16>}, {transform_indices = @transform_2, window_bounds = array<i64: 32, 384>}]} {
    %0 = tpu.iota {dimensions = array<i32: 0>} : vector<16x384xi32>
    %1 = tpu.iota {dimensions = array<i32: 1>} : vector<16x384xi32>
    %c0_i32 = arith.constant 0 : i32
    %2 = arith.cmpi eq, %arg0, %c0_i32 : i32
    %3 = arith.extui %2 : i1 to i32
    %c0_i32_0 = arith.constant 0 : i32
    %4 = arith.cmpi ne, %3, %c0_i32_0 : i32
    scf.if %4 {
      %c1_i32_2 = arith.constant 1 : i32
      %8 = vector.broadcast %c1_i32_2 : i32 to vector<16x384xi32>
      %9 = arith.addi %0, %8 : vector<16x384xi32>
      %c24_i32 = arith.constant 24 : i32
      %10 = vector.broadcast %c24_i32 : i32 to vector<16x384xi32>
      %11 = arith.muli %9, %10 : vector<16x384xi32>
      %12 = arith.cmpi sge, %1, %11 : vector<16x384xi32>
      %13 = arith.extui %12 : vector<16x384xi1> to vector<16x384xi32>
      %14 = arith.sitofp %13 : vector<16x384xi32> to vector<16x384xf32>
      %cst = arith.constant dense<0.000000e+00> : vector<384xf32>
      %15 = vector.multi_reduction <add>, %14, %cst [0] : vector<16x384xf32> to vector<384xf32>
      %16 = vector.shape_cast %15 : vector<384xf32> to vector<1x384xf32>
      %17 = tpu.iota {dimensions = array<i32: 1>} : vector<1x384xi32>
      %18 = arith.sitofp %17 : vector<1x384xi32> to vector<1x384xf32>
      %cst_3 = arith.constant 2.400000e+01 : f32
      %19 = vector.broadcast %cst_3 : f32 to vector<1x384xf32>
      %20 = arith.mulf %16, %19 : vector<1x384xf32>
      %21 = arith.subf %18, %20 : vector<1x384xf32>
      %22 = tpu.iota {dimensions = array<i32: 0>} : vector<24x384xi32>
      %23 = arith.sitofp %22 : vector<24x384xi32> to vector<24x384xf32>
      %24 = vector.shape_cast %21 : vector<1x384xf32> to vector<1x384xf32>
      %25 = vector.broadcast %24 : vector<1x384xf32> to vector<24x384xf32>
      %26 = arith.cmpf oeq, %25, %23 : vector<24x384xf32>
      %27 = arith.extui %26 : vector<24x384xi1> to vector<24x384xi32>
      %28 = arith.sitofp %27 : vector<24x384xi32> to vector<24x384xf32>
      %c0 = arith.constant 0 : index
      %c0_4 = arith.constant 0 : index
      %29 = vector.load %arg2[%c0, %c0_4] : memref<32x24xf32, #tpu.memory_space<vmem>>, vector<32x24xf32>
      %cst_5 = arith.constant dense<0.000000e+00> : vector<32x384xf32>
      %30 = tpu.matmul %29, %28, %cst_5 {dimension_numbers = #tpu.dot_dimension_numbers<[1], [0], [0], [1], [0, 0, 1, 1], [], []>} : vector<32x24xf32>, vector<24x384xf32>, vector<32x384xf32> -> vector<32x384xf32>
      %c0_6 = arith.constant 0 : index
      %c0_7 = arith.constant 0 : index
      %31 = vector.load %arg4[%c0_6, %c0_7] : memref<32x384xf32, #tpu.memory_space<vmem>>, vector<32x384xf32>
      tpu.vector_store %arg4[%c0_6, %c0_7], %30 {strides = array<i32>} : memref<32x384xf32, #tpu.memory_space<vmem>>, vector<32x384xf32>,
    } else {
    }
    %c1_i32 = arith.constant 1 : i32
    %5 = arith.cmpi eq, %arg0, %c1_i32 : i32
    %6 = arith.extui %5 : i1 to i32
    %c0_i32_1 = arith.constant 0 : i32
    %7 = arith.cmpi ne, %6, %c0_i32_1 : i32
    scf.if %7 {
      %c24_i32 = arith.constant 24 : i32
      %8 = vector.broadcast %c24_i32 : i32 to vector<16x384xi32>
      %9 = arith.muli %0, %8 : vector<16x384xi32>
      %10 = arith.cmpi sge, %1, %9 : vector<16x384xi32>
      %c24_i32_2 = arith.constant 24 : i32
      %11 = vector.broadcast %c24_i32_2 : i32 to vector<16x384xi32>
      %12 = arith.addi %9, %11 : vector<16x384xi32>
      %13 = arith.cmpi slt, %1, %12 : vector<16x384xi32>
      %14 = arith.andi %10, %13 : vector<16x384xi1>
      %15 = arith.extui %14 : vector<16x384xi1> to vector<16x384xi32>
      %16 = arith.sitofp %15 : vector<16x384xi32> to vector<16x384xf32>
      %c0 = arith.constant 0 : index
      %c0_3 = arith.constant 0 : index
      %17 = vector.load %arg3[%c0, %c0_3] : memref<32x16xf32, #tpu.memory_space<vmem>>, vector<32x16xf32>
      %cst = arith.constant dense<0.000000e+00> : vector<32x384xf32>
      %18 = tpu.matmul %17, %16, %cst {dimension_numbers = #tpu.dot_dimension_numbers<[1], [0], [0], [1], [0, 0, 1, 1], [], []>} : vector<32x16xf32>, vector<16x384xf32>, vector<32x384xf32> -> vector<32x384xf32>
      %c0_4 = arith.constant 0 : index
      %c0_5 = arith.constant 0 : index
      %19 = vector.load %arg4[%c0_4, %c0_5] : memref<32x384xf32, #tpu.memory_space<vmem>>, vector<32x384xf32>
      tpu.vector_store %arg4[%c0_4, %c0_5], %18 {strides = array<i32>} : memref<32x384xf32, #tpu.memory_space<vmem>>, vector<32x384xf32>,
    } else {
    }
    return
  }
  func.func @transform_0(%arg0: i32, %arg1: i32) -> (i32, i32) {
    %c0_i32 = arith.constant 0 : i32
    %c0_i32_0 = arith.constant 0 : i32
    return %arg1, %c0_i32 : i32, i32
  }
  func.func @transform_1(%arg0: i32, %arg1: i32) -> (i32, i32) {
    %c0_i32 = arith.constant 0 : i32
    %c0_i32_0 = arith.constant 0 : i32
    return %arg1, %c0_i32 : i32, i32
  }
  func.func @transform_2(%arg0: i32, %arg1: i32) -> (i32, i32) {
    %c1_i32 = arith.constant 1 : i32
    %0 = arith.muli %arg0, %c1_i32 : i32
    %1 = arith.addi %0, %arg1 : i32
    %c0_i32 = arith.constant 0 : i32
    %c0_i32_0 = arith.constant 0 : i32
    return %1, %c0_i32 : i32, i32
  }
}

</mosaic_0001>

<bundles_post_ra>
// kernel: tpu_custom_call.1
= control target key start
LH: loop header
LB: loop body
LE: loop exit
PB: predicated region body
PF: predicated region fallthrough
CT: control target
= control target key end

     0   :  { %7 = vsyncpa [#allocation3], 0  ;;  %s1348_s0 = inlined_call_operand.vmem [shape: f32[32,24], index: 0, kind: input, shape index: {}]   ;;  %s1349_s1 = inlined_call_operand.vmem [shape: f32[32,16], index: 1, kind: input, shape index: {}]   ;;  %s1350_s2 = inlined_call_operand.hbm [shape: f32[64,384], index: 2, kind: output, shape index: {}]  }
   0x1   :  { %9 = vsyncpa [#allocation3 + $0x1], 0  ;;  %s1110_s9 = smov 0   ;;  %s1112_s10 = smov 0  }
   0x2   :  { %s1114_s11 = smov 0   ;;  %s1116_s12 = smov 0  }
   0x3   :  { %s1118_s13 = smov 0   ;;  %s1120_s14 = smov 0  }
   0x4 LB: > { %s825_s15 = sadd.s32 4294967295, %s1085_s14   ;;  %s826_s16 = sadd.s32 4294967294, %s1085_s14   ;;  %s1085_s14 = sphi %s1120_s14, %s15_s14   ;;  %s1081_s13 = sphi %s1118_s13, %s1357_s13   ;;  %s1077_s12 = sphi %s1116_s12, %s1356_s12   ;;  %s1073_s11 = sphi %s1114_s11, %s1355_s11   ;;  %s1069_s10 = sphi %s1112_s10, %s1354_s10   ;;  %s1065_s9 = sphi %s1110_s9, %s1353_s9  }
   0x5   : > { %s27_s17 = sadd.s32 1, %s1081_s13  ;;  %s88_s18 = sadd.s32 1, %s1073_s11 }
   0x6   : > { %p29_p0 = scmp.ge.s32.totalorder %s27_s17, 2  ;;  %p98_p1 = scmp.ne.s32.totalorder %s1073_s11, %s1069_s10 }
   0x7   : > { %p99_p2 = scmp.eq.s32.totalorder %s825_s15, 1  ;;  %p104_p3 = scmp.ne.s32.totalorder %s1069_s10, %s1065_s9 }
   0x8   : > { %s1359_s17 = smov (%p29_p0, %s27_s17), 0  ;;  %p105_p5 = scmp.eq.s32.totalorder %s826_s16, 1 }
   0x9   : > { %p1150_p4 = por %p99_p2, %p98_p1  ;;  %s85_s20 = ssub.s32 %s1081_s13, %s1359_s17 }
   0xa   : > { %p830_p6 = scmp.ge.s32.totalorder %s1085_s14, 1  ;;  %p86_p7 = scmp.eq.s32.totalorder %s85_s20, 0 }
   0xb   : > { %p1157_p8 = por %p105_p5, %p104_p3  ;;  %p141_p9 = scmp.lt.s32.totalorder %s1085_s14, 3 }
   0xc   : > { %s1163_s22 = scalar_select %p86_p7, %s1073_s11, %s88_s18  }
   0xd   : > { %p142_p10 = pnand %p830_p6, %p141_p9 }
   0xe   : > { %s165_s23 = sand.u32 (!%p142_p10), 1, %s1069_s10   ;;  %v182_v0 = vlaneseq (!%p142_p10)  ;;  %p831_p11 = scmp.ne.s32.totalorder (!%p142_p10), %s1077_s12, 0 }
   0xf   : > { %145 = sbr.rel (%p142_p10) target bundleno = 544 (0x220), region = 28 }
  0x10   : > { %s943_s24 = smul.u32 (!%p142_p10), 96, %s165_s23  ;;  %v1168_v1 = vshrl.u32 (!%p142_p10), %v182_v0, 7  ;;  %v1170_v2 = vand.u32 (!%p142_p10), 127, %v182_v0 }
  0x12   : > { %v1173_v3 = vadd.s32 (!%p142_p10), 8, %v1168_v1  ;;  %v1176_v4 = vadd.s32 (!%p142_p10), 128, %v1170_v2  ;;  %v1179_v5 = vadd.s32 (!%p142_p10), 256, %v1170_v2  ;;  %s1181_s25 = scalar_lea.vmem (!%p142_p10), [#allocation2], %s943_s24 }
  0x16   : > { %192 = sbr.rel (%p831_p11) target bundleno = 280 (0x118), region = 32  ;;  %v193_v6 = vadd.s32 (!%p831_p11), 1, %v1168_v1  ;;  %v194_v7 = vadd.s32 (!%p831_p11), 1, %v1173_v3  ;;  %v1087_v8 = vmov (!%p831_p11), 0.0   ;;  %v1190_v11 = vld [vmem:[%s1348_s0] sm:$0xff] (!%p831_p11)  ;;  %vm280_vm0 = vcmask (!%p831_p11), 195584  }
  0x17   : > { %357 = vmatprep.mubr.f32.mxu0 (!%p831_p11), %v1087_v8  ;;  %909 = vmatprep.mubr.msk.f32.mxu1 (!%p831_p11), %vm280_vm0, %v1190_v11  ;;  %v245_v34 = vadd.s32 (!%p831_p11), 16, %v1168_v1  ;;  %v237_v37 = vcvt.s32.f32 (!%p831_p11), %v1176_v4  ;;  %v236_v39 = vcvt.s32.f32 (!%p831_p11), %v1170_v2  ;;  %v246_v42 = vcvt.s32.f32 (!%p831_p11), %v1168_v1  ;;  %v277_v54 = vld [vmem:[%s1348_s0 + $0x8] sm:$0xff] (!%p831_p11)  ;;  %v278_v55 = vld [vmem:[%s1348_s0 + $0x10] sm:$0xff] (!%p831_p11)  ;;  %v279_v56 = vld [vmem:[%s1348_s0 + $0x18] sm:$0xff] (!%p831_p11) }
  0x18   : > { %v195_v9 = vmul.u32 (!%p831_p11), 24, %v193_v6  ;;  %v196_v10 = vmul.u32 (!%p831_p11), 24, %v194_v7  ;;  %v247_v43 = vcvt.s32.f32 (!%p831_p11), %v1173_v3  ;;  %v238_v47 = vcvt.s32.f32 (!%p831_p11), %v1179_v5 }
  0x19   : > { %v248_v45 = vcvt.s32.f32 (!%p831_p11), %v245_v34  ;;  %v1088_v52 = vmov (!%p831_p11), 1.0|1.0   ;;  %v1089_v53 = vmov (!%p831_p11), 1.0  }
  0x1a   : > { %vm198_vm1 = vcmp.ge.s32.totalorder (!%p831_p11), %v1176_v4, %v195_v9  ;;  %vm201_vm2 = vcmp.ge.s32.totalorder (!%p831_p11), %v1176_v4, %v196_v10  ;;  %vm197_vm3 = vcmp.ge.s32.totalorder (!%p831_p11), %v1170_v2, %v195_v9  ;;  %vm200_vm4 = vcmp.ge.s32.totalorder (!%p831_p11), %v1170_v2, %v196_v10 }
  0x1b   : > { %v833_v12 = vsel (!%p831_p11), %vm198_vm1, 1.0, %v1087_v8  ;;  %v836_v13 = vsel (!%p831_p11), %vm201_vm2, 1.0, %v1087_v8  ;;  %v832_v14 = vsel (!%p831_p11), %vm197_vm3, 1.0, %v1087_v8  ;;  %v835_v15 = vsel (!%p831_p11), %vm200_vm4, 1.0, %v1087_v8 }
  0x1c   : > { %v222_v16 = vadd.f32 (!%p831_p11), %v836_v13, %v833_v12  ;;  %v215_v17 = vadd.f32 (!%p831_p11), %v835_v15, %v832_v14  ;;  %vm199_vm5 = vcmp.ge.s32.totalorder (!%p831_p11), %v1179_v5, %v195_v9  ;;  %vm202_vm6 = vcmp.ge.s32.totalorder (!%p831_p11), %v1179_v5, %v196_v10 }
  0x1d   : > { %v834_v18 = vsel %vm199_vm5, 1.0, %v1087_v8  ;;  %v837_v21 = vsel %vm202_vm6, 1.0, %v1087_v8 }
  0x1e   : > { %v223_v19 = vrot.slane %v222_v16, 4  ;;  %v216_v20 = vrot.slane %v215_v17, 4  ;;  %v229_v22 = vadd.f32 %v837_v21, %v834_v18 }
  0x20   : > { %v224_v23 = vadd.f32 %v223_v19, %v222_v16  ;;  %v217_v24 = vadd.f32 %v216_v20, %v215_v17  ;;  %v230_v25 = vrot.slane %v229_v22, 4 }
  0x22   : > { %v225_v26 = vrot.slane %v224_v23, 2  ;;  %v218_v27 = vrot.slane %v217_v24, 2  ;;  %v231_v28 = vadd.f32 %v230_v25, %v229_v22 }
  0x24   : > { %v226_v29 = vadd.f32 %v225_v26, %v224_v23  ;;  %v219_v30 = vadd.f32 %v218_v27, %v217_v24  ;;  %v232_v31 = vrot.slane %v231_v28, 2 }
  0x26   : > { %v227_v32 = vrot.slane %v226_v29, 1  ;;  %v220_v33 = vrot.slane %v219_v30, 1  ;;  %v233_v35 = vadd.f32 %v232_v31, %v231_v28 }
  0x28   : > { %v228_v36 = vadd.f32 %v227_v32, %v226_v29  ;;  %v221_v38 = vadd.f32 %v220_v33, %v219_v30  ;;  %v234_v40 = vrot.slane %v233_v35, 1 }
  0x2a   : > { %v240_v41 = vmul.f32 24.0, %v228_v36  ;;  %v239_v44 = vmul.f32 24.0, %v221_v38  ;;  %v235_v46 = vadd.f32 %v234_v40, %v233_v35 }
  0x2c   : > { %v243_v48 = vsub.f32 %v237_v37, %v240_v41  ;;  %v242_v49 = vsub.f32 %v236_v39, %v239_v44  ;;  %v241_v50 = vmul.f32 24.0, %v235_v46 }
  0x2e   : > { %vm250_vm7 = vcmp.eq.f32.partialorder %v243_v48, %v246_v42  ;;  %vm253_vm8 = vcmp.eq.f32.partialorder %v243_v48, %v247_v43  ;;  %vm249_vm9 = vcmp.eq.f32.partialorder %v242_v49, %v246_v42  ;;  %vm252_vm10 = vcmp.eq.f32.partialorder %v242_v49, %v247_v43 }
  0x2f   : > { %vm925_vm11 = vmpackc.low %vm253_vm8, %vm250_vm7  ;;  %vm256_vm12 = vcmp.eq.f32.partialorder %v243_v48, %v248_v45  ;;  %v244_v51 = vsub.f32 %v238_v47, %v241_v50  ;;  %vm255_vm1 = vcmp.eq.f32.partialorder %v242_v49, %v248_v45 }
  0x30   : > { %926 = vmatprep.subr.msk.bf16.mxu0 %vm925_vm11, %v1088_v52  ;;  %vm927_vm13 = vmpackc.low %vm252_vm10, %vm249_vm9 }
  0x31   : > { %928 = vmatpush1.bf16.msk.msra.mxu0 %vm927_vm13, %v1088_v52  ;;  %vm251_vm14 = vcmp.eq.f32.partialorder %v244_v51, %v246_v42  ;;  %vm254_vm15 = vcmp.eq.f32.partialorder %v244_v51, %v247_v43  ;;  %vm257_vm3 = vcmp.eq.f32.partialorder %v244_v51, %v248_v45 }
  0x32   : > { %851 = vmatprep.subr.msk.mxu0 %vm256_vm12, %v1089_v53  ;;  %vm929_vm2 = vmpackc.low %vm254_vm15, %vm251_vm14 }
  0x33   : > { %930 = vmatprep.subr.msk.bf16.mxu1 %vm929_vm2, %v1088_v52 }
  0x34   : > { %932 = vmatpush3.bf16.msk.msra.mxu1 %vm929_vm2, %v1088_v52 }
  0x35   : > { %852 = vmatpush1.msk.msra.mxu0 %vm255_vm1, %v1089_v53  ;;  %907 = vmatprep.subr.msk.mxu1 %vm257_vm3, %v1089_v53 }
  0x36   : > { %853 = vmatmul.mubr.msk.f32.vlgmr.msra.gmra.mrb[0].mxu0 %vm280_vm0, %v1190_v11 }
  0x37   : > { %363 = vmatprep.mubr.f32.mxu0 %v1087_v8 }
  0x38   : > { %908 = vmatpush3.msk.msra.mxu1 %vm257_vm3, %v1089_v53 }
  0x39   : > { %910 = vmatmul.mubr.msk.f32.vlgmr.msra.gmra.mrb[0].mxu1 %vm280_vm0, %v277_v54 }
  0x3a   : > { %854 = vmatmul.mubr.msk.f32.gmra.mrb[2].mxu0 %vm280_vm0, %v277_v54  ;;  %912 = vmatprep.mubr.msk.f32.mxu1 %vm280_vm0, %v278_v55 }
  0x3b   : > { %369 = vmatprep.mubr.f32.mxu0 %v1087_v8 }
  0x3d   : > { %913 = vmatmul.mubr.msk.f32.gmra.mrb[2].mxu1 %vm280_vm0, %v279_v56 }
  0x3e   : > { %855 = vmatmul.mubr.msk.f32.gmra.mrb[4].mxu0 %vm280_vm0, %v278_v55 }
  0x3f   : > { %375 = vmatprep.mubr.f32.mxu0 %v1087_v8 }
  0x42   : > { %856 = vmatmul.mubr.msk.f32.gmra.mrb[6].mxu0 %vm280_vm0, %v279_v56 }
 0x109   : > { %v359_v57 = vpop.f32.mrb[0].mxu0 }
 0x10a   : > { %467 = vst [vmem:[%s1181_s25] sm:$0xff] %v359_v57  ;;  %v361_v58 = vpop.f32.mrb[1].mxu0 }
 0x10b   : > { %468 = vst [vmem:[%s1181_s25 + $0x8] sm:$0xff] %v361_v58 }
 0x10c   : > { %v911_v59 = vpop.f32.mrb[0].mxu1 }
 0x10d   : > { %v365_v60 = vpop.f32.mrb[2].mxu0  ;;  %472 = vst [vmem:[%s1181_s25 + $0x28] sm:$0xff] %v911_v59  ;;  %v448_v61 = vpop.f32.mrb[1].mxu1 }
 0x10e   : > { %470 = vst [vmem:[%s1181_s25 + $0x18] sm:$0xff] %v365_v60  ;;  %v367_v62 = vpop.f32.mrb[3].mxu0  ;;  %469 = vst [vmem:[%s1181_s25 + $0x10] sm:$0xff] %v448_v61 }
 0x10f   : > { %471 = vst [vmem:[%s1181_s25 + $0x20] sm:$0xff] %v367_v62 }
 0x110   : > { %v914_v63 = vpop.f32.mrb[2].mxu1 }
 0x111   : > { %v371_v0 = vpop.f32.mrb[4].mxu0  ;;  %478 = vst [vmem:[%s1181_s25 + $0x58] sm:$0xff] %v914_v63  ;;  %v458_v6 = vpop.f32.mrb[3].mxu1 }
 0x112   : > { %473 = vst [vmem:[%s1181_s25 + $0x30] sm:$0xff] %v371_v0  ;;  %v373_v7 = vpop.f32.mrb[5].mxu0  ;;  %475 = vst [vmem:[%s1181_s25 + $0x40] sm:$0xff] %v458_v6 }
 0x113   : > { %474 = vst [vmem:[%s1181_s25 + $0x38] sm:$0xff] %v373_v7 }
 0x115   : > { %v377_v8 = vpop.f32.mrb[6].mxu0 }
 0x116   : > { %476 = vst [vmem:[%s1181_s25 + $0x48] sm:$0xff] %v377_v8  ;;  %v379_v9 = vpop.f32.mrb[7].mxu0 }
 0x117   : > { %477 = vst [vmem:[%s1181_s25 + $0x50] sm:$0xff] %v379_v9 }
 0x118 PF: > { %p864_p12 = scmp.ne.s32.totalorder %s1077_s12, 1 }
 0x119   : > { %v483_v10 = vmul.u32 (!%p864_p12), 24, %v1168_v1  ;;  %v484_v11 = vmul.u32 (!%p864_p12), 24, %v1173_v3  ;;  %v1090_v12 = vmov (!%p864_p12), 0.0   ;;  %v1091_v1 = vmov (!%p864_p12), 1.0|1.0   ;;  %v520_v3 = vld [vmem:[%s1349_s1 + $0x18] sm:$0xff] (!%p864_p12) }
 0x11a   : > { %482 = sbr.rel (%p864_p12) target bundleno = 518 (0x206), region = 36  ;;  %598 = vmatprep.mubr.f32.mxu0 (!%p864_p12), %v1090_v12  ;;  %616 = vmatprep.mubr.f32.mxu1 (!%p864_p12), %v1090_v12 }
 0x11b   : > { %vm486_vm0 = vcmp.ge.s32.totalorder (!%p864_p12), %v1176_v4, %v483_v10  ;;  %v491_v13 = vadd.s32 (!%p864_p12), 24, %v483_v10  ;;  %v492_v14 = vadd.s32 (!%p864_p12), 24, %v484_v11  ;;  %vm489_vm4 = vcmp.ge.s32.totalorder (!%p864_p12), %v1176_v4, %v484_v11 }
 0x11c   : > { %vm485_vm8 = vcmp.ge.s32.totalorder (!%p864_p12), %v1170_v2, %v483_v10  ;;  %vm488_vm11 = vcmp.ge.s32.totalorder (!%p864_p12), %v1170_v2, %v484_v11  ;;  %vm487_vm15 = vcmp.ge.s32.totalorder (!%p864_p12), %v1179_v5, %v483_v10  ;;  %vm490_vm3 = vcmp.ge.s32.totalorder (!%p864_p12), %v1179_v5, %v484_v11 }
 0x11d   : > { %vm494_vm5 = vcmp.lt.s32.totalorder (!%p864_p12), %v1176_v4, %v491_v13  ;;  %vm497_vm6 = vcmp.lt.s32.totalorder (!%p864_p12), %v1176_v4, %v492_v14  ;;  %vm493_vm9 = vcmp.lt.s32.totalorder (!%p864_p12), %v1170_v2, %v491_v13  ;;  %vm496_vm12 = vcmp.lt.s32.totalorder (!%p864_p12), %v1170_v2, %v492_v14  ;;  %v517_v2 = vld [vmem:[%s1349_s1] sm:$0xff] (!%p864_p12)  ;;  %v518_v4 = vld [vmem:[%s1349_s1 + $0x8] sm:$0xff] (!%p864_p12) }
 0x11e   : > { %vm500_vm7 = vmand (!%p864_p12), %vm486_vm0, %vm494_vm5  ;;  %vm495_vm1 = vcmp.lt.s32.totalorder (!%p864_p12), %v1179_v5, %v491_v13  ;;  %vm498_vm0 = vcmp.lt.s32.totalorder (!%p864_p12), %v1179_v5, %v492_v14  ;;  %v519_v5 = vld [vmem:[%s1349_s1 + $0x10] sm:$0xff] (!%p864_p12) }
 0x11f   : > { %vm503_vm10 = vmand (!%p864_p12), %vm489_vm4, %vm497_vm6  ;;  %vm521_vm4 = vcmask (!%p864_p12), 130048  }
 0x120   : > { %vm933_vm13 = vmpackc.low (!%p864_p12), %vm503_vm10, %vm500_vm7 }
 0x121   : > { %934 = vmatprep.subr.msk.bf16.mxu0 %vm933_vm13, %v1091_v1  ;;  %941 = vmatprep.subr.msk.bf16.mxu1 %vm933_vm13, %v1091_v1  ;;  %vm499_vm14 = vmand %vm485_vm8, %vm493_vm9 }
 0x122   : > { %vm502_vm2 = vmand %vm488_vm11, %vm496_vm12 }
 0x123   : > { %vm935_vm5 = vmpackc.low %vm502_vm2, %vm499_vm14 }
 0x124   : > { %936 = vmatpush1.bf16.msk.msra.mxu0 %vm935_vm5, %v1091_v1  ;;  %942 = vmatpush1.bf16.msk.msra.mxu1 %vm935_vm5, %v1091_v1  ;;  %vm501_vm6 = vmand %vm487_vm15, %vm495_vm1 }
 0x125   : > { %vm504_vm7 = vmand %vm490_vm3, %vm498_vm0 }
 0x126   : > { %vm937_vm8 = vmpackc.low %vm504_vm7, %vm501_vm6 }
 0x127   : > { %875 = vmatmul.mubr.msk.f32.vlgmr.msra.gmra.mrb[0].mxu0 %vm521_vm4, %v517_v2  ;;  %878 = vmatmul.mubr.msk.f32.vlgmr.msra.gmra.mrb[0].mxu1 %vm521_vm4, %v520_v3 }
 0x128   : > { %938 = vmatprep.subr.msk.bf16.mxu1 %vm937_vm8, %v1091_v1  ;;  %604 = vmatprep.mubr.f32.mxu0 %v1090_v12 }
 0x129   : > { %940 = vmatpush3.bf16.msk.msra.mxu1 %vm937_vm8, %v1091_v1  ;;  %919 = vmatprep.mubr.msk.f32.mxu1 %vm521_vm4, %v517_v2 }
 0x12b   : > { %876 = vmatmul.mubr.msk.f32.gmra.mrb[2].mxu0 %vm521_vm4, %v518_v4 }
 0x12c   : > { %920 = vmatmul.mubr.msk.f32.vlgmr.msra.gmra.mrb[2].mxu1 %vm521_vm4, %v518_v4  ;;  %610 = vmatprep.mubr.f32.mxu0 %v1090_v12 }
 0x12d   : > { %922 = vmatprep.mubr.msk.f32.mxu1 %vm521_vm4, %v519_v5 }
 0x12f   : > { %877 = vmatmul.mubr.msk.f32.gmra.mrb[4].mxu0 %vm521_vm4, %v519_v5 }
 0x130   : > { %923 = vmatmul.mubr.msk.f32.gmra.mrb[4].mxu1 %vm521_vm4, %v520_v3 }
 0x1fa   : > { %v600_v15 = vpop.f32.mrb[0].mxu0  ;;  %v618_v16 = vpop.f32.mrb[0].mxu1 }
 0x1fb   : > { %708 = vst [vmem:[%s1181_s25] sm:$0xff] %v600_v15  ;;  %717 = vst [vmem:[%s1181_s25 + $0x48] sm:$0xff] %v618_v16  ;;  %v602_v17 = vpop.f32.mrb[1].mxu0  ;;  %v620_v18 = vpop.f32.mrb[1].mxu1 }
 0x1fc   : > { %709 = vst [vmem:[%s1181_s25 + $0x8] sm:$0xff] %v602_v17  ;;  %718 = vst [vmem:[%s1181_s25 + $0x50] sm:$0xff] %v620_v18 }
 0x1fe   : > { %v606_v19 = vpop.f32.mrb[2].mxu0 }
 0x1ff   : > { %711 = vst [vmem:[%s1181_s25 + $0x18] sm:$0xff] %v606_v19  ;;  %v921_v20 = vpop.f32.mrb[2].mxu1  ;;  %v608_v21 = vpop.f32.mrb[3].mxu0 }
 0x200   : > { %713 = vst [vmem:[%s1181_s25 + $0x28] sm:$0xff] %v921_v20  ;;  %712 = vst [vmem:[%s1181_s25 + $0x20] sm:$0xff] %v608_v21  ;;  %v689_v22 = vpop.f32.mrb[3].mxu1 }
 0x201   : > { %710 = vst [vmem:[%s1181_s25 + $0x10] sm:$0xff] %v689_v22 }
 0x202   : > { %v612_v23 = vpop.f32.mrb[4].mxu0 }
 0x203   : > { %714 = vst [vmem:[%s1181_s25 + $0x30] sm:$0xff] %v612_v23  ;;  %v924_v24 = vpop.f32.mrb[4].mxu1  ;;  %v614_v25 = vpop.f32.mrb[5].mxu0 }
 0x204   : > { %719 = vst [vmem:[%s1181_s25 + $0x58] sm:$0xff] %v924_v24  ;;  %715 = vst [vmem:[%s1181_s25 + $0x38] sm:$0xff] %v614_v25  ;;  %v699_v26 = vpop.f32.mrb[5].mxu1 }
 0x205   : > { %716 = vst [vmem:[%s1181_s25 + $0x40] sm:$0xff] %v699_v26 }
 0x206 PF: > { %s944_s26 = smul.u32 1536, %s1077_s12  ;;  %s736_s27 = sshll.u32 %s1181_s25, 4  ;;  %s1298_s27 = int_to_ptr.vmem [resolvable:$true] %s736_s27 }
 0x207   : > { %s1302_s3 = scalar_lea.sflag [#allocation3], %s165_s23  ;;  %s1007_s4 = scalar_lea.vmem %s1298_s27, 1536 }
 0x208   : > { %s1296_s30 = scalar_lea.hbm %s1350_s2, %s944_s26  ;;  %p1008_p13 = scmp.ne.s32.totalorder %s1298_s27, %s1007_s4 }
 0x209   : > { %s1092_s12 = smov [#allocation2]  }
 0x20a   : > { %p1009_p0 = pnand %p1008_p13, %p1150_p4  ;;  %s1011_s25 = sshll.u32 %s1092_s12, 4  ;;  %s1012_s25 = int_to_ptr.vmem [resolvable:$false] %s1011_s25 }
 0x20b   : > { %s1013_s5 = scalar_lea.vmem %s1012_s25, 3072  ;;  %p1014_p2 = scmp.lt.s32.totalorder %s1298_s27, %s1012_s25 }
 0x20c   : > { %p1010_p1 = pneg %p1009_p0  ;;  %p1015_p3 = scmp.lt.s32.totalorder %s1013_s5, %s1007_s4 }
 0x20e   : > { %p1016_p5 = por %p1015_p3, %p1014_p2 }
 0x210   : > { %p1017_p6 = pnand %p1016_p5, %p1010_p1 }
 0x212   : > { %1020 = shalt.err (!%p1017_p6)
}
 0x213   : > { %s1021_s23 = scalar_lea.hbm %s1296_s30, 1536  ;;  %s1025_s8 = scalar_lea.hbm %s1350_s2, 3072 }
 0x214   : > { %p1022_p7 = scmp.ne.s32.totalorder %s1296_s30, %s1021_s23  ;;  %p1026_p11 = scmp.lt.u32.totalorder %s1296_s30, %s1350_s2 }
 0x215   : > { %p1027_p12 = scmp.lt.u32.totalorder %s1025_s8, %s1021_s23  ;;  %p1029_p0 = scmp.lt.u32.totalorder %s1021_s23, %s1296_s30 }
 0x216   : > { %p1023_p9 = pnand %p1022_p7, %p1150_p4 }
 0x217   : > { %p1028_p13 = por %p1027_p12, %p1026_p11 }
 0x218   : > { %p1024_p10 = pneg %p1023_p9 }
 0x219   : > { %p1030_p1 = por %p1029_p0, %p1028_p13 }
 0x21b   : > { %p1031_p2 = pnand %p1030_p1, %p1024_p10 }
 0x21d   : > { %1034 = shalt.err (!%p1031_p2)
}
 0x21e   : > { %s1093_s18 = smov 384   ;;  %s1094_s20 = smov 24  }
 0x21f   : > { %945 = dma.vmem_to_hbm [thread:$0]  (%p1150_p4), %s1298_s27, 1536, %s1296_s30, %s1302_s3, %s1093_s18, %s1093_s18, %s1094_s20  }
 0x220 PF: > { %p951_p3 = scmp.ge.s32.totalorder %s1085_s14, 2  ;;  %s751_s24 = sand.u32 1, %s1065_s9  }
 0x221   : > { %s752_s26 = scalar_lea.sflag [#allocation3], %s751_s24 }
 0x222   : > { %p948_p5 = pnand %p951_p3, %p1157_p8 }
 0x224   : > { %1060 = dma.done.wait (!%p948_p5), %s752_s26, 1536  }
 0x225   : > { %1062 = vsyncadd (!%p948_p5), %s752_s26, 4294965760  ;;  %s15_s14 = sadd.s32 1, %s1085_s14   ;;  %s1353_s9 = smov %s1069_s10 }
 0x226   : > { %p12_p6 = scmp.ge.s32.totalorder %s15_s14, 4   ;;  %s1354_s10 = smov %s1073_s11 }
 0x227   : > { %s1355_s11 = smov %s1163_s22  ;;  %s1356_s12 = smov %s1081_s13 }
 0x228   : > { %s1357_s13 = smov %s1359_s17  ;;  %14 = sbr.rel (!%p12_p6) target bundleno = 4 (0x4), region = 74 }
 0x22f   :  { %757 = vsyncpa [#allocation3], 1 }
 0x230   :  { %759 = vsyncpa [#allocation3 + $0x1], 1 }

</bundles_post_ra>
